<compile_context>
chip_gen: v6e
topology: v6e:2x2x1
jax: 0.10.0
libtpu: 0.0.40
codegen_flags: <defaults>
</compile_context>

<pallas_src>
import math

import jax
import jax.numpy as jnp
from jax.experimental import pallas as pl
from jax.experimental.pallas import tpu as pltpu


AVG_K = 30      # AvgPool1d kernel_size
AVG_PAD = 14    # AvgPool1d padding


def _cnn1d_kernel(x_ref, m1_ref, b1_ref, w2_ref, b2_ref, out_ref):
    # (TB, L*C) @ (L*C, 32*Lc) -> fused avgpool+conv pre-activation,
    # flattened channel-major exactly like torch's .view(B, -1).
    h = (jnp.dot(x_ref[...], m1_ref[...], preferred_element_type=jnp.float32)
         + b1_ref[...])
    h = jnp.tanh(h)
    # (TB, 32*Lc) @ (32*Lc, L) + bias -> final Linear
    out_ref[...] = (jnp.dot(h, w2_ref[...], preferred_element_type=jnp.float32)
                    + b2_ref[...])


def _build_fused_conv_weight(w_conv, b_conv, seq_len):
    """Fold permute + AvgPool1d(30,1,14) + Conv1d into one dense matrix.

    Returns M1 of shape (L*C, 32*Lc) and b1 of shape (1, 32*Lc) such that the
    conv pre-activation, flattened exactly like torch's .view(B, -1)
    (channel-major: index = o*Lc + p), equals x.reshape(B, L*C) @ M1 + b1.
    Depends only on module parameters, not on the input.
    """
    O, C, K = w_conv.shape
    L = seq_len
    Lp = L - 1                  # AvgPool1d output length
    Lc = Lp - K + 1             # Conv1d output length (== L // 2 for odd L)

    j = jnp.arange(L)[:, None]          # original sequence positions
    t = jnp.arange(Lp)[None, :]         # avgpool output positions
    # avgpool (count_include_pad=True): out[t] = sum_{j=t-14..t+15} x[j] / 30
    P = (((j >= t - AVG_PAD) & (j <= t + (AVG_K - AVG_PAD - 1)))
         .astype(jnp.float32) / float(AVG_K))             # (L, Lp)

    # M[j, c, o, p] = sum_k P[j, p+k] * w_conv[o, c, k]
    cols = [jnp.einsum('jk,ock->jco', P[:, p:p + K], w_conv) for p in range(Lc)]
    M = jnp.stack(cols, axis=-1)                          # (L, C, O, Lc)
    M1 = M.reshape(L * C, O * Lc)                         # row j*C+c, col o*Lc+p
    b1 = jnp.repeat(b_conv, Lc)[None, :]                  # (1, O*Lc)
    return M1, b1


def cnn1d_forward_pallas(x, params, *, batch_tile=8):
    w_conv, b_conv, w_fc, b_fc = params
    B, L, C = x.shape

    M1, b1 = _build_fused_conv_weight(w_conv, b_conv, L)  # (L*C, F), (1, F)
    w2 = w_fc.T                                           # (F, L)
    b2 = b_fc[None, :]                                    # (1, L)

    x_flat = x.reshape(B, L * C)                          # (j, c) -> j*C + c
    TB = batch_tile
    Bp = ((B + TB - 1) // TB) * TB                        # sublane-full tiles
    if Bp != B:
        x_flat = jnp.pad(x_flat, ((0, Bp - B), (0, 0)))

    Kin, F = M1.shape

    out = pl.pallas_call(
        _cnn1d_kernel,
        out_shape=jax.ShapeDtypeStruct((Bp, L), jnp.float32),
        grid_spec=pltpu.PrefetchScalarGridSpec(
            num_scalar_prefetch=0,
            grid=(Bp // TB,),
            in_specs=[
                pl.BlockSpec((TB, Kin), lambda i: (i, 0)),   # x batch tile
                pl.BlockSpec((Kin, F), lambda i: (0, 0)),    # fused pool+conv W
                pl.BlockSpec((1, F), lambda i: (0, 0)),      # conv bias (flat)
                pl.BlockSpec((F, L), lambda i: (0, 0)),      # fc weight (T)
                pl.BlockSpec((1, L), lambda i: (0, 0)),      # fc bias
            ],
            out_specs=pl.BlockSpec((TB, L), lambda i: (i, 0)),
        ),
        compiler_params=pltpu.CompilerParams(
            dimension_semantics=("parallel",)),
    )(x_flat, M1, b1, w2, b2)
    return out[:B]


def cnn1d_forward_reference(x, params):
    """Pure-JAX faithful translation of the PyTorch forward (for validation)."""
    w_conv, b_conv, w_fc, b_fc = params
    B, L, C = x.shape
    xp = jnp.transpose(x, (0, 2, 1))                      # (B, C, L)
    xpad = jnp.pad(xp, ((0, 0), (0, 0), (AVG_PAD, AVG_PAD)))
    Lp = L - 1
    a = jnp.stack([xpad[:, :, t:t + AVG_K].sum(-1) for t in range(Lp)],
                  axis=-1) / float(AVG_K)                 # AvgPool1d(30,1,14)
    y = jax.lax.conv_general_dilated(
        a, w_conv, window_strides=(1,), padding='VALID',
        dimension_numbers=('NCH', 'OIH', 'NCH')) + b_conv[None, :, None]
    h = jnp.tanh(y).reshape(B, -1)
    return h @ w_fc.T + b_fc[None, :]


if __name__ == "__main__":
    # Small shapes consistent with the module.  seq_length must be odd for the
    # flattened conv output to match fc's in_features (implicit in the PyTorch
    # module: conv out length = L-1-(L//2+1)+1 == L//2 only for odd L).
    L, C, B, O = 33, 2, 16, 32
    K = L // 2 + 1
    Lc = L // 2

    key = jax.random.PRNGKey(0)
    keys = jax.random.split(key, 5)

    def u(k, shape, bound):
        return jax.random.uniform(k, shape, jnp.float32, -bound, bound)

    kc = 1.0 / math.sqrt(C * K)
    kf = 1.0 / math.sqrt(O * Lc)
    params = (
        u(keys[0], (O, C, K), kc),       # conv.weight
        u(keys[1], (O,), kc),            # conv.bias
        u(keys[2], (L, O * Lc), kf),     # fc.weight
        u(keys[3], (L,), kf),            # fc.bias
    )
    x = jax.random.normal(keys[4], (B, L, C), jnp.float32)

    out = jax.block_until_ready(cnn1d_forward_pallas(x, params))
    ref = jax.block_until_ready(cnn1d_forward_reference(x, params))

    assert out.shape == (B, L)
    err = float(jnp.max(jnp.abs(out - ref)))
    assert jnp.allclose(out, ref, atol=2e-3, rtol=2e-3), err
    print("KERNEL_OK")
</pallas_src>

<mosaic_0001>
module attributes {stable_mosaic.version = 11 : i64} {
  func.func @_cnn1d_kernel(%arg0: i32, %arg1: memref<8x66xf32, #tpu.memory_space<vmem>>, %arg2: memref<66x512xf32, #tpu.memory_space<vmem>>, %arg3: memref<1x512xf32, #tpu.memory_space<vmem>>, %arg4: memref<512x33xf32, #tpu.memory_space<vmem>>, %arg5: memref<1x33xf32, #tpu.memory_space<vmem>>, %arg6: memref<8x33xf32, #tpu.memory_space<vmem>>) attributes {dimension_semantics = [#tpu.dimension_semantics<parallel>], iteration_bounds = array<i64: 2>, scalar_prefetch = 0 : i64, scratch_operands = 0 : i64, tpu.core_type = #tpu.core_type<tc>, window_params = [{transform_indices = @transform_0, window_bounds = array<i64: 8, 66>}, {pipeline_mode = #tpu.pipeline_mode<synchronous>, transform_indices = @transform_1, window_bounds = array<i64: 66, 512>}, {pipeline_mode = #tpu.pipeline_mode<synchronous>, transform_indices = @transform_2, window_bounds = array<i64: 1, 512>}, {pipeline_mode = #tpu.pipeline_mode<synchronous>, transform_indices = @transform_3, window_bounds = array<i64: 512, 33>}, {pipeline_mode = #tpu.pipeline_mode<synchronous>, transform_indices = @transform_4, window_bounds = array<i64: 1, 33>}, {transform_indices = @transform_5, window_bounds = array<i64: 8, 33>}]} {
    %c0 = arith.constant 0 : index
    %c0_0 = arith.constant 0 : index
    %0 = vector.load %arg1[%c0, %c0_0] : memref<8x66xf32, #tpu.memory_space<vmem>>, vector<8x66xf32>
    %c0_1 = arith.constant 0 : index
    %c0_2 = arith.constant 0 : index
    %1 = vector.load %arg2[%c0_1, %c0_2] : memref<66x512xf32, #tpu.memory_space<vmem>>, vector<66x512xf32>
    %cst = arith.constant dense<0.000000e+00> : vector<8x512xf32>
    %2 = tpu.matmul %0, %1, %cst {dimension_numbers = #tpu.dot_dimension_numbers<[1], [0], [0], [1], [0, 0, 1, 1], [], []>} : vector<8x66xf32>, vector<66x512xf32>, vector<8x512xf32> -> vector<8x512xf32>
    %c0_3 = arith.constant 0 : index
    %c0_4 = arith.constant 0 : index
    %3 = vector.load %arg3[%c0_3, %c0_4] : memref<1x512xf32, #tpu.memory_space<vmem>>, vector<1x512xf32>
    %4 = vector.broadcast %3 : vector<1x512xf32> to vector<8x512xf32>
    %5 = arith.addf %2, %4 : vector<8x512xf32>
    %6 = math.tanh %5 : vector<8x512xf32>
    %c0_5 = arith.constant 0 : index
    %c0_6 = arith.constant 0 : index
    %7 = vector.load %arg4[%c0_5, %c0_6] : memref<512x33xf32, #tpu.memory_space<vmem>>, vector<512x33xf32>
    %cst_7 = arith.constant dense<0.000000e+00> : vector<8x33xf32>
    %8 = tpu.matmul %6, %7, %cst_7 {dimension_numbers = #tpu.dot_dimension_numbers<[1], [0], [0], [1], [0, 0, 1, 1], [], []>} : vector<8x512xf32>, vector<512x33xf32>, vector<8x33xf32> -> vector<8x33xf32>
    %c0_8 = arith.constant 0 : index
    %c0_9 = arith.constant 0 : index
    %9 = vector.load %arg5[%c0_8, %c0_9] : memref<1x33xf32, #tpu.memory_space<vmem>>, vector<1x33xf32>
    %10 = vector.broadcast %9 : vector<1x33xf32> to vector<8x33xf32>
    %11 = arith.addf %8, %10 : vector<8x33xf32>
    %c0_10 = arith.constant 0 : index
    %c0_11 = arith.constant 0 : index
    %12 = vector.load %arg6[%c0_10, %c0_11] : memref<8x33xf32, #tpu.memory_space<vmem>>, vector<8x33xf32>
    tpu.vector_store %arg6[%c0_10, %c0_11], %11 {strides = array<i32>} : memref<8x33xf32, #tpu.memory_space<vmem>>, vector<8x33xf32>,
    return
  }
  func.func @transform_0(%arg0: i32) -> (i32, i32) {
    %c0_i32 = arith.constant 0 : i32
    %c0_i32_0 = arith.constant 0 : i32
    return %arg0, %c0_i32 : i32, i32
  }
  func.func @transform_1(%arg0: i32) -> (i32, i32) {
    %c0_i32 = arith.constant 0 : i32
    %c0_i32_0 = arith.constant 0 : i32
    %c0_i32_1 = arith.constant 0 : i32
    return %c0_i32, %c0_i32_0 : i32, i32
  }
  func.func @transform_2(%arg0: i32) -> (i32, i32) {
    %c0_i32 = arith.constant 0 : i32
    %c0_i32_0 = arith.constant 0 : i32
    %c0_i32_1 = arith.constant 0 : i32
    return %c0_i32, %c0_i32_0 : i32, i32
  }
  func.func @transform_3(%arg0: i32) -> (i32, i32) {
    %c0_i32 = arith.constant 0 : i32
    %c0_i32_0 = arith.constant 0 : i32
    %c0_i32_1 = arith.constant 0 : i32
    return %c0_i32, %c0_i32_0 : i32, i32
  }
  func.func @transform_4(%arg0: i32) -> (i32, i32) {
    %c0_i32 = arith.constant 0 : i32
    %c0_i32_0 = arith.constant 0 : i32
    %c0_i32_1 = arith.constant 0 : i32
    return %c0_i32, %c0_i32_0 : i32, i32
  }
  func.func @transform_5(%arg0: i32) -> (i32, i32) {
    %c0_i32 = arith.constant 0 : i32
    %c0_i32_0 = arith.constant 0 : i32
    return %arg0, %c0_i32 : i32, i32
  }
}

</mosaic_0001>

<bundles_post_ra>
// kernel: tpu_custom_call.1
= control target key start
LH: loop header
LB: loop body
LE: loop exit
PB: predicated region body
PF: predicated region fallthrough
CT: control target
= control target key end

     0   :  { %10 = vsyncpa [#allocation3], 0  ;;  %s1355_s0 = inlined_call_operand.vmem [shape: f32[16,66], index: 0, kind: input, shape index: {}]   ;;  %s1356_s1 = inlined_call_operand.vmem [shape: f32[66,512], index: 1, kind: input, shape index: {}]   ;;  %s1357_s2 = inlined_call_operand.vmem [shape: f32[1,512], index: 2, kind: input, shape index: {}]   ;;  %s1358_s3 = inlined_call_operand.vmem [shape: f32[512,33], index: 3, kind: input, shape index: {}]   ;;  %s1359_s4 = inlined_call_operand.vmem [shape: f32[1,33], index: 4, kind: input, shape index: {}]   ;;  %s1360_s5 = inlined_call_operand.hbm [shape: f32[16,33], index: 5, kind: output, shape index: {}]  }
   0x1   :  { %12 = vsyncpa [#allocation3 + $0x1], 0  ;;  %s957_s18 = smov 0   ;;  %s959_s19 = smov 0  }
   0x2   :  { %s961_s20 = smov 0   ;;  %s963_s21 = smov 0  }
   0x3 LB: > { %s978_s22 = sadd.s32 4294967295, %s923_s21   ;;  %s728_s23 = sadd.s32 4294967294, %s923_s21   ;;  %s923_s21 = sphi %s963_s21, %s1366_s21   ;;  %s919_s20 = sphi %s961_s20, %s1365_s20   ;;  %s915_s19 = sphi %s959_s19, %s1364_s19   ;;  %s911_s18 = sphi %s957_s18, %s1363_s18  }
   0x4   : > { %s982_s24 = sadd.s32 1, %s923_s21   ;;  %s135_s25 = sadd.s32 1, %s919_s20 }
   0x5   : > { %s132_s26 = ssub.s32 %s923_s21, %s982_s24  ;;  %p145_p0 = scmp.ne.s32.totalorder %s919_s20, %s915_s19 }
   0x6   : > { %p133_p1 = scmp.eq.s32.totalorder %s132_s26, 0  ;;  %p146_p2 = scmp.eq.s32.totalorder %s978_s22, 1 }
   0x7   : > { %p151_p3 = scmp.ne.s32.totalorder %s915_s19, %s911_s18  ;;  %p152_p4 = scmp.eq.s32.totalorder %s728_s23, 1 }
   0x8   : > { %s993_s27 = scalar_select %p133_p1, %s919_s20, %s135_s25  }
   0x9   : > { %p995_p5 = por %p146_p2, %p145_p0  ;;  %p999_p6 = por %p152_p4, %p151_p3 }
   0xa   : > { %p731_p7 = scmp.ge.s32.totalorder %s923_s21, 1  ;;  %p189_p8 = scmp.lt.s32.totalorder %s923_s21, 3 }
   0xc   : > { %p190_p9 = pnand %p731_p7, %p189_p8 }
   0xd   : > { %p216_p10 = scmp.lt.s32.totalorder (!%p190_p9), %s978_s22, 1  ;;  %s213_s30 = sand.u32 (!%p190_p9), 1, %s915_s19  }
   0xe   : > { %193 = sbr.rel (%p190_p9) target bundleno = 465 (0x1d1), region = 40  ;;  %s732_s6 = sshll.u32 (!%p190_p9), %s213_s30, 3 }
   0xf   : > { %s742_s8 = sshll.u32 (!%p190_p9), %s978_s22, 7  ;;  %s215_s9 = scalar_lea.vmem (!%p190_p9), [#allocation2], %s732_s6 }
  0x10   : > { %s669_s10 = sshll.u32 (!%p190_p9), %s215_s9, 4  ;;  %s656_s16 = scalar_lea.sflag (!%p190_p9), [#allocation3], %s213_s30  ;;  %s670_s10 = int_to_ptr.vmem [resolvable:$true] %s669_s10 }
  0x11   : > { %s863_s17 = scalar_lea.vmem (!%p190_p9), %s670_s10, 128  ;;  %s926_s23 = smov (!%p190_p9), [#allocation2]  }
  0x12   : > { %p864_p11 = scmp.ne.s32.totalorder (!%p190_p9), %s670_s10, %s863_s17 }
  0x13   : > { %v254_v0 = vld [vmem:[%s1356_s1 + $0x108] sm:$0x3]  ;;  %vm283_vm0 = vcmask 1041408   ;;  %v256_v1 = vld [vmem:[%s1356_s1 + $0x118] sm:$0x3]  ;;  %v249_v6 = vld [vmem:[%s1356_s1 + $0xe0] sm:$0xff] }
  0x14   : > { %v250_v2 = vld [vmem:[%s1356_s1 + $0xe8] sm:$0xff]  ;;  %734 = vmatprep.subr.msk.mxu0 %vm283_vm0, %v254_v0  ;;  %737 = vmatprep.subr.msk.mxu1 %vm283_vm0, %v256_v1  ;;  %v253_v3 = vld [vmem:[%s1356_s1 + $0x100] sm:$0x3]  ;;  %v255_v4 = vld [vmem:[%s1356_s1 + $0x110] sm:$0x3]  ;;  %s1069_s13 = scalar_select %p216_p10, %s978_s22, 1 }
  0x15   : > { %v252_v5 = vld [vmem:[%s1356_s1 + $0xf8] sm:$0xff]  ;;  %735 = vmatpush1.msk.msra.mxu0 %vm283_vm0, %v253_v3  ;;  %738 = vmatpush1.msk.msra.mxu1 %vm283_vm0, %v255_v4  ;;  %v251_v7 = vld [vmem:[%s1356_s1 + $0xf0] sm:$0xff]  ;;  %v246_v8 = vld [vmem:[%s1356_s1 + $0xc8] sm:$0xff]  ;;  %vm279_vm1 = vcmask 539648   ;;  %v925_v37 = vmov 0.0   ;;  %vm653_vm2 = vcmask 269312   ;;  %p865_p12 = pnand %p864_p11, %p995_p5 }
  0x16   : > { %312 = vmatprep.subr.mxu0 %v250_v2  ;;  %383 = vmatprep.subr.mxu1 %v252_v5  ;;  %v248_v9 = vld [vmem:[%s1356_s1 + $0xd8] sm:$0xff]  ;;  %v245_v10 = vld [vmem:[%s1356_s1 + $0xc0] sm:$0xff]  ;;  %v247_v11 = vld [vmem:[%s1356_s1 + $0xd0] sm:$0xff]  ;;  %s733_s15 = sshll.u32 %s1069_s13, 3  ;;  %s867_s22 = sshll.u32 %s926_s23, 4  ;;  %s868_s22 = int_to_ptr.vmem [resolvable:$false] %s867_s22 }
  0x17   : > { %313 = vmatpush1.msra.mxu0 %v249_v6  ;;  %384 = vmatpush1.msra.mxu1 %v251_v7  ;;  %v242_v12 = vld [vmem:[%s1356_s1 + $0xa8] sm:$0xff]  ;;  %v244_v13 = vld [vmem:[%s1356_s1 + $0xb8] sm:$0xff]  ;;  %v241_v14 = vld [vmem:[%s1356_s1 + $0xa0] sm:$0xff]  ;;  %s219_s14 = scalar_lea.vmem %s1355_s0, %s733_s15  ;;  %p866_p13 = pneg %p865_p12 }
  0x18   : > { %314 = vmatprep.subr.mxu0 %v246_v8  ;;  %385 = vmatprep.subr.mxu1 %v248_v9  ;;  %v243_v15 = vld [vmem:[%s1356_s1 + $0xb0] sm:$0xff]  ;;  %v238_v16 = vld [vmem:[%s1356_s1 + $0x88] sm:$0xff]  ;;  %v240_v17 = vld [vmem:[%s1356_s1 + $0x98] sm:$0xff]  ;;  %s869_s25 = scalar_lea.vmem %s868_s22, 256  ;;  %p870_p0 = scmp.lt.s32.totalorder %s670_s10, %s868_s22 }
  0x19   : > { %315 = vmatpush1.msra.mxu0 %v245_v10  ;;  %386 = vmatpush1.msra.mxu1 %v247_v11  ;;  %v237_v18 = vld [vmem:[%s1356_s1 + $0x80] sm:$0xff]  ;;  %v239_v19 = vld [vmem:[%s1356_s1 + $0x90] sm:$0xff]  ;;  %v234_v20 = vld [vmem:[%s1356_s1 + $0x68] sm:$0xff]  ;;  %p871_p1 = scmp.lt.s32.totalorder %s869_s25, %s863_s17 }
  0x1a   : > { %316 = vmatprep.subr.mxu0 %v242_v12  ;;  %387 = vmatprep.subr.mxu1 %v244_v13  ;;  %v236_v21 = vld [vmem:[%s1356_s1 + $0x78] sm:$0xff]  ;;  %v233_v22 = vld [vmem:[%s1356_s1 + $0x60] sm:$0xff]  ;;  %v235_v23 = vld [vmem:[%s1356_s1 + $0x70] sm:$0xff] }
  0x1b   : > { %317 = vmatpush1.msra.mxu0 %v241_v14  ;;  %388 = vmatpush1.msra.mxu1 %v243_v15  ;;  %v230_v24 = vld [vmem:[%s1356_s1 + $0x48] sm:$0xff]  ;;  %v232_v25 = vld [vmem:[%s1356_s1 + $0x58] sm:$0xff]  ;;  %v229_v26 = vld [vmem:[%s1356_s1 + $0x40] sm:$0xff]  ;;  %p872_p2 = por %p871_p1, %p870_p0 }
  0x1c   : > { %318 = vmatprep.subr.mxu0 %v238_v16  ;;  %389 = vmatprep.subr.mxu1 %v240_v17  ;;  %v231_v27 = vld [vmem:[%s1356_s1 + $0x50] sm:$0xff]  ;;  %v226_v28 = vld [vmem:[%s1356_s1 + $0x28] sm:$0xff]  ;;  %v228_v29 = vld [vmem:[%s1356_s1 + $0x38] sm:$0xff] }
  0x1d   : > { %319 = vmatpush1.msra.mxu0 %v237_v18  ;;  %390 = vmatpush1.msra.mxu1 %v239_v19  ;;  %v225_v30 = vld [vmem:[%s1356_s1 + $0x20] sm:$0xff]  ;;  %v227_v31 = vld [vmem:[%s1356_s1 + $0x30] sm:$0xff]  ;;  %v222_v32 = vld [vmem:[%s1356_s1 + $0x8] sm:$0xff]  ;;  %p873_p3 = pnand %p872_p2, %p866_p13 }
  0x1e   : > { %320 = vmatprep.subr.mxu0 %v234_v20  ;;  %391 = vmatprep.subr.mxu1 %v236_v21  ;;  %v224_v33 = vld [vmem:[%s1356_s1 + $0x18] sm:$0xff]  ;;  %v221_v34 = vld [vmem:[%s1356_s1] sm:$0xff]  ;;  %v223_v35 = vld [vmem:[%s1356_s1 + $0x10] sm:$0xff] }
  0x1f   : > { %321 = vmatpush1.msra.mxu0 %v233_v22  ;;  %392 = vmatpush1.msra.mxu1 %v235_v23  ;;  %v220_v36 = vld [vmem:[%s219_s14] sm:$0xff]  ;;  %v473_v38 = vld [vmem:[%s1358_s3 + $0xf8] sm:$0xff]  ;;  %v472_v42 = vld [vmem:[%s1358_s3 + $0xf0] sm:$0xff]  ;;  %s667_s14 = scalar_lea.hbm %s1360_s5, %s742_s8 }
  0x20   : > { %322 = vmatprep.subr.mxu0 %v230_v24  ;;  %393 = vmatprep.subr.mxu1 %v232_v25  ;;  %v505_v39 = vld [vmem:[%s1358_s3 + $0x1f8] sm:$0xff]  ;;  %v504_v43 = vld [vmem:[%s1358_s3 + $0x1f0] sm:$0xff]  ;;  %v471_v46 = vld [vmem:[%s1358_s3 + $0xe8] sm:$0xff] }
  0x21   : > { %323 = vmatpush1.msra.mxu0 %v229_v26  ;;  %394 = vmatpush1.msra.mxu1 %v231_v27  ;;  %v457_v40 = vld [vmem:[%s1358_s3 + $0x78] sm:$0xff]  ;;  %v456_v44 = vld [vmem:[%s1358_s3 + $0x70] sm:$0xff]  ;;  %v503_v47 = vld [vmem:[%s1358_s3 + $0x1e8] sm:$0xff] }
  0x22   : > { %324 = vmatprep.subr.mxu0 %v226_v28  ;;  %395 = vmatprep.subr.mxu1 %v228_v29  ;;  %v489_v41 = vld [vmem:[%s1358_s3 + $0x178] sm:$0xff]  ;;  %v488_v45 = vld [vmem:[%s1358_s3 + $0x170] sm:$0xff]  ;;  %v455_v48 = vld [vmem:[%s1358_s3 + $0x68] sm:$0xff] }
  0x23   : > { %325 = vmatpush1.msra.mxu0 %v225_v30  ;;  %396 = vmatpush1.msra.mxu1 %v227_v31  ;;  %v487_v49 = vld [vmem:[%s1358_s3 + $0x168] sm:$0xff]  ;;  %v470_v50 = vld [vmem:[%s1358_s3 + $0xe0] sm:$0xff]  ;;  %v469_v54 = vld [vmem:[%s1358_s3 + $0xd8] sm:$0xff] }
  0x24   : > { %326 = vmatprep.subr.mxu0 %v222_v32  ;;  %397 = vmatprep.subr.mxu1 %v224_v33  ;;  %v502_v51 = vld [vmem:[%s1358_s3 + $0x1e0] sm:$0xff]  ;;  %v501_v55 = vld [vmem:[%s1358_s3 + $0x1d8] sm:$0xff]  ;;  %v468_v58 = vld [vmem:[%s1358_s3 + $0xd0] sm:$0xff] }
  0x25   : > { %327 = vmatpush1.msra.mxu0 %v221_v34  ;;  %360 = vmatprep.mubr.f32.mxu0 %v925_v37  ;;  %v454_v52 = vld [vmem:[%s1358_s3 + $0x60] sm:$0xff]  ;;  %v453_v56 = vld [vmem:[%s1358_s3 + $0x58] sm:$0xff]  ;;  %v500_v59 = vld [vmem:[%s1358_s3 + $0x1d0] sm:$0xff] }
  0x26   : > { %398 = vmatpush1.msra.mxu1 %v223_v35  ;;  %431 = vmatprep.mubr.f32.mxu1 %v925_v37  ;;  %v486_v53 = vld [vmem:[%s1358_s3 + $0x160] sm:$0xff]  ;;  %v485_v57 = vld [vmem:[%s1358_s3 + $0x158] sm:$0xff]  ;;  %v452_v60 = vld [vmem:[%s1358_s3 + $0x50] sm:$0xff] }
  0x27   : > { %736 = vmatmul.mubr.msk.f32.vlgmr.msra.gmra.mxu0 %vm279_vm1, %v220_v36  ;;  %739 = vmatmul.mubr.msk.f32.vlgmr.msra.gmra.mxu1 %vm279_vm1, %v220_v36  ;;  %v484_v61 = vld [vmem:[%s1358_s3 + $0x150] sm:$0xff]  ;;  %v467_v62 = vld [vmem:[%s1358_s3 + $0xc8] sm:$0xff]  ;;  %v466_v2 = vld [vmem:[%s1358_s3 + $0xc0] sm:$0xff] }
  0x28   : > { %745 = vmatprep.subr.mxu0 %v473_v38  ;;  %780 = vmatprep.subr.mxu1 %v505_v39  ;;  %v499_v63 = vld [vmem:[%s1358_s3 + $0x1c8] sm:$0xff]  ;;  %v498_v3 = vld [vmem:[%s1358_s3 + $0x1c0] sm:$0xff]  ;;  %v465_v6 = vld [vmem:[%s1358_s3 + $0xb8] sm:$0xff]  ;;  %v259_v38 = vlaneseq }
  0x29   : > { %746 = vmatpush3.msra.mxu0 %v457_v40  ;;  %781 = vmatpush3.msra.mxu1 %v489_v41  ;;  %v451_v0 = vld [vmem:[%s1358_s3 + $0x48] sm:$0xff]  ;;  %v450_v4 = vld [vmem:[%s1358_s3 + $0x40] sm:$0xff]  ;;  %v497_v7 = vld [vmem:[%s1358_s3 + $0x1b8] sm:$0xff] }
  0x2a   : > { %747 = vmatprep.subr.mxu0 %v472_v42  ;;  %782 = vmatprep.subr.mxu1 %v504_v43  ;;  %v483_v1 = vld [vmem:[%s1358_s3 + $0x148] sm:$0xff]  ;;  %v482_v5 = vld [vmem:[%s1358_s3 + $0x140] sm:$0xff]  ;;  %v449_v8 = vld [vmem:[%s1358_s3 + $0x38] sm:$0xff]  ;;  %v260_v39 = vshrl.u32 %v259_v38, 7 }
  0x2b   : > { %748 = vmatpush3.msra.mxu0 %v456_v44  ;;  %783 = vmatpush3.msra.mxu1 %v488_v45  ;;  %v481_v9 = vld [vmem:[%s1358_s3 + $0x138] sm:$0xff]  ;;  %v464_v10 = vld [vmem:[%s1358_s3 + $0xb0] sm:$0xff]  ;;  %v463_v14 = vld [vmem:[%s1358_s3 + $0xa8] sm:$0xff] }
  0x2c   : > { %749 = vmatprep.subr.mxu0 %v471_v46  ;;  %784 = vmatprep.subr.mxu1 %v503_v47  ;;  %v496_v11 = vld [vmem:[%s1358_s3 + $0x1b0] sm:$0xff]  ;;  %v495_v15 = vld [vmem:[%s1358_s3 + $0x1a8] sm:$0xff]  ;;  %v462_v18 = vld [vmem:[%s1358_s3 + $0xa0] sm:$0xff]  ;;  %v261_v40 = vsub.s32 0, %v260_v39  ;;  %v269_v41 = vsub.s32 2, %v260_v39  ;;  %v265_v43 = vsub.s32 1, %v260_v39 }
  0x2d   : > { %750 = vmatpush3.msra.mxu0 %v455_v48  ;;  %785 = vmatpush3.msra.mxu1 %v487_v49  ;;  %v448_v12 = vld [vmem:[%s1358_s3 + $0x30] sm:$0xff]  ;;  %v447_v16 = vld [vmem:[%s1358_s3 + $0x28] sm:$0xff]  ;;  %v494_v19 = vld [vmem:[%s1358_s3 + $0x1a0] sm:$0xff]  ;;  %v273_v44 = vsub.s32 3, %v260_v39 }
  0x2e   : > { %751 = vmatprep.subr.mxu0 %v470_v50  ;;  %786 = vmatprep.subr.mxu1 %v502_v51  ;;  %v480_v13 = vld [vmem:[%s1358_s3 + $0x130] sm:$0xff]  ;;  %v479_v17 = vld [vmem:[%s1358_s3 + $0x128] sm:$0xff]  ;;  %v446_v20 = vld [vmem:[%s1358_s3 + $0x20] sm:$0xff] }
  0x2f   : > { %752 = vmatpush3.msra.mxu0 %v454_v52  ;;  %787 = vmatpush3.msra.mxu1 %v486_v53  ;;  %v478_v21 = vld [vmem:[%s1358_s3 + $0x120] sm:$0xff]  ;;  %v461_v22 = vld [vmem:[%s1358_s3 + $0x98] sm:$0xff]  ;;  %v460_v26 = vld [vmem:[%s1358_s3 + $0x90] sm:$0xff] }
  0x30   : > { %753 = vmatprep.subr.mxu0 %v469_v54  ;;  %788 = vmatprep.subr.mxu1 %v501_v55  ;;  %v493_v23 = vld [vmem:[%s1358_s3 + $0x198] sm:$0xff]  ;;  %v492_v27 = vld [vmem:[%s1358_s3 + $0x190] sm:$0xff]  ;;  %v459_v30 = vld [vmem:[%s1358_s3 + $0x88] sm:$0xff] }
  0x31   : > { %754 = vmatpush3.msra.mxu0 %v453_v56  ;;  %789 = vmatpush3.msra.mxu1 %v485_v57  ;;  %v445_v24 = vld [vmem:[%s1358_s3 + $0x18] sm:$0xff]  ;;  %v444_v28 = vld [vmem:[%s1358_s3 + $0x10] sm:$0xff]  ;;  %v491_v31 = vld [vmem:[%s1358_s3 + $0x188] sm:$0xff] }
  0x32   : > { %755 = vmatprep.subr.mxu0 %v468_v58  ;;  %790 = vmatprep.subr.mxu1 %v500_v59  ;;  %v477_v25 = vld [vmem:[%s1358_s3 + $0x118] sm:$0xff]  ;;  %v476_v29 = vld [vmem:[%s1358_s3 + $0x110] sm:$0xff]  ;;  %v443_v32 = vld [vmem:[%s1358_s3 + $0x8] sm:$0xff] }
  0x33   : > { %756 = vmatpush3.msra.mxu0 %v452_v60  ;;  %791 = vmatpush3.msra.mxu1 %v484_v61  ;;  %v475_v33 = vld [vmem:[%s1358_s3 + $0x108] sm:$0xff]  ;;  %v458_v34 = vld [vmem:[%s1358_s3 + $0x80] sm:$0xff] }
  0x34   : > { %757 = vmatprep.subr.mxu0 %v467_v62  ;;  %792 = vmatprep.subr.mxu1 %v499_v63  ;;  %v490_v35 = vld [vmem:[%s1358_s3 + $0x180] sm:$0xff] }
  0x35   : > { %758 = vmatpush3.msra.mxu0 %v451_v0  ;;  %793 = vmatpush3.msra.mxu1 %v483_v1  ;;  %v442_v36 = vld [vmem:[%s1358_s3] sm:$0xff] }
  0x36   : > { %759 = vmatprep.subr.mxu0 %v466_v2  ;;  %794 = vmatprep.subr.mxu1 %v498_v3  ;;  %v474_v37 = vld [vmem:[%s1358_s3 + $0x100] sm:$0xff] }
  0x37   : > { %760 = vmatpush3.msra.mxu0 %v450_v4  ;;  %795 = vmatpush3.msra.mxu1 %v482_v5  ;;  %v257_v42 = vld [vmem:[%s1357_s2] sm:$0xf] }
  0x38   : > { %761 = vmatprep.subr.mxu0 %v465_v6  ;;  %796 = vmatprep.subr.mxu1 %v497_v7  ;;  %v262_v45 = vrot.slane %v257_v42, %v261_v40  ;;  %v270_v46 = vrot.slane %v257_v42, %v269_v41  ;;  %v266_v47 = vrot.slane %v257_v42, %v265_v43  ;;  %v740_v63 = vld [vmem:[%s1359_s4] ss:$0 sm:$0xff] }
  0x39   : > { %762 = vmatpush3.msra.mxu0 %v449_v8  ;;  %797 = vmatpush3.msra.mxu1 %v481_v9  ;;  %v274_v48 = vrot.slane %v257_v42, %v273_v44 }
  0x3a   : > { %763 = vmatprep.subr.mxu0 %v464_v10  ;;  %798 = vmatprep.subr.mxu1 %v496_v11 }
  0x3b   : > { %764 = vmatpush3.msra.mxu0 %v448_v12  ;;  %799 = vmatpush3.msra.mxu1 %v480_v13 }
  0x3c   : > { %765 = vmatprep.subr.mxu0 %v463_v14  ;;  %800 = vmatprep.subr.mxu1 %v495_v15 }
  0x3d   : > { %766 = vmatpush3.msra.mxu0 %v447_v16  ;;  %801 = vmatpush3.msra.mxu1 %v479_v17 }
  0x3e   : > { %767 = vmatprep.subr.mxu0 %v462_v18  ;;  %802 = vmatprep.subr.mxu1 %v494_v19 }
  0x3f   : > { %768 = vmatpush3.msra.mxu0 %v446_v20  ;;  %803 = vmatpush3.msra.mxu1 %v478_v21 }
  0x40   : > { %769 = vmatprep.subr.mxu0 %v461_v22  ;;  %804 = vmatprep.subr.mxu1 %v493_v23 }
  0x41   : > { %770 = vmatpush3.msra.mxu0 %v445_v24  ;;  %805 = vmatpush3.msra.mxu1 %v477_v25 }
  0x42   : > { %771 = vmatprep.subr.mxu0 %v460_v26  ;;  %806 = vmatprep.subr.mxu1 %v492_v27 }
  0x43   : > { %772 = vmatpush3.msra.mxu0 %v444_v28  ;;  %807 = vmatpush3.msra.mxu1 %v476_v29 }
  0x44   : > { %773 = vmatprep.subr.mxu0 %v459_v30  ;;  %808 = vmatprep.subr.mxu1 %v491_v31 }
  0x45   : > { %774 = vmatpush3.msra.mxu0 %v443_v32  ;;  %809 = vmatpush3.msra.mxu1 %v475_v33 }
  0x46   : > { %775 = vmatprep.subr.mxu0 %v458_v34  ;;  %810 = vmatprep.subr.mxu1 %v490_v35 }
  0x47   : > { %776 = vmatpush3.msra.mxu0 %v442_v36  ;;  %811 = vmatpush3.msra.mxu1 %v474_v37 }
  0xe7   : > { %v362_v49 = vpop.f32.mrf.mxu0  ;;  %v433_v50 = vpop.f32.mrf.mxu1 }
  0xe8   : > { %v363_v51 = vadd.f32 %v362_v49, %v262_v45  ;;  %v434_v52 = vadd.f32 %v433_v50, %v270_v46 }
  0xe9   : > { %v364_v53 = vpop.f32.mrf.mxu0  ;;  %v435_v54 = vpop.f32.mrf.mxu1 }
  0xea   : > { %855 = vtanh.f32 %v363_v51  ;;  %v365_v55 = vadd.f32 %v364_v53, %v266_v47  ;;  %v436_v56 = vadd.f32 %v435_v54, %v274_v48 }
  0xeb   : > { %857 = vtanh.f32 %v434_v52 }
  0xec   : > { %859 = vtanh.f32 %v365_v55 }
  0xed   : > { %861 = vtanh.f32 %v436_v56 }
  0xf7   : > { %v856_v57 = vpop.eup %855 }
  0xf8   : > { %v858_v58 = vpop.eup %857 }
  0xf9   : > { %v860_v59 = vpop.eup %859 }
  0xfa   : > { %v862_v60 = vpop.eup %861  ;;  %577 = vmatprep.mubr.f32.mxu0 %v860_v59 }
  0xfb   : > { %647 = vmatprep.mubr.f32.mxu1 %v862_v60  ;;  %578 = vmatmul.mubr.f32.vlgmr.msra.gmra.mxu0 %v856_v57 }
  0xfc   : > { %648 = vmatmul.mubr.f32.vlgmr.msra.gmra.mxu1 %v858_v58 }
 0x1bb   : > { %v777_v61 = vpop.f32.mrf.mxu0 }
 0x1bc   : > { %v812_v62 = vpop.f32.mrf.mxu1 }
 0x1bd   : > { %v778_v0 = vpop.f32.mrf.mxu0 }
 0x1be   : > { %v779_v1 = vadd.f32 %v778_v0, %v777_v61  ;;  %v813_v2 = vpop.f32.mrf.mxu1 }
 0x1bf   : > { %v814_v4 = vadd.f32 %v813_v2, %v812_v62 }
 0x1c0   : > { %v580_v3 = vadd.f32 %v779_v1, %v740_v63 }
 0x1c2   : > { %v650_v5 = vadd.f32 %v814_v4, %v580_v3 }
 0x1c4   : > { %654 = vst.msk [vmem:[%s215_s9] sm:$0xff] %vm653_vm2, %v650_v5 }
 0x1c5   : > { %876 = shalt.err (!%p873_p3)
}
 0x1c6   : > { %s877_s15 = scalar_lea.hbm %s667_s14, 128  ;;  %s881_s6 = scalar_lea.hbm %s1360_s5, 256 }
 0x1c7   : > { %p878_p4 = scmp.ne.s32.totalorder %s667_s14, %s877_s15  ;;  %p882_p9 = scmp.lt.s32.totalorder %s667_s14, %s1360_s5 }
 0x1c8   : > { %p883_p10 = scmp.lt.s32.totalorder %s881_s6, %s877_s15 }
 0x1c9   : > { %p879_p7 = pnand %p878_p4, %p995_p5 }
 0x1ca   : > { %p884_p11 = por %p883_p10, %p882_p9 }
 0x1cb   : > { %p880_p8 = pneg %p879_p7 }
 0x1cd   : > { %p885_p12 = pnand %p884_p11, %p880_p8 }
 0x1cf   : > { %888 = shalt.err (!%p885_p12)
}
 0x1d0   : > { %815 = dma.vmem_to_hbm [thread:$0]  (%p995_p5), %s670_s10, 128, %s667_s14, %s656_s16  }
 0x1d1 PF: > { %p821_p13 = scmp.ge.s32.totalorder %s923_s21, 2  ;;  %s681_s8 = sand.u32 1, %s911_s18  }
 0x1d2   : > { %s682_s9 = scalar_lea.sflag [#allocation3], %s681_s8 }
 0x1d3   : > { %p818_p0 = pnand %p821_p13, %p999_p6 }
 0x1d5   : > { %p819_p1 = pneg %p818_p0 }
 0x1d7   : > { %906 = dma.done.wait (%p819_p1), %s682_s9, 128  }
 0x1d8   : > { %908 = vsyncadd (%p819_p1), %s682_s9, 4294967168  ;;  %p15_p2 = scmp.ge.s32.totalorder %s982_s24, 4   ;;  %s1363_s18 = smov %s915_s19 }
 0x1d9   : > { %s1364_s19 = smov %s919_s20  ;;  %s1365_s20 = smov %s993_s27 }
 0x1da   : > { %s1366_s21 = smov %s982_s24  ;;  %17 = sbr.rel (!%p15_p2) target bundleno = 3 (0x3), region = 75 }
 0x1df   :  { %687 = vsyncpa [#allocation3], 1 }
 0x1e0   :  { %689 = vsyncpa [#allocation3 + $0x1], 1 }

</bundles_post_ra>
